<compile_context>
chip_gen: v7x
topology: tpu7x:2x2x1
jax: 0.10.0
libtpu: 0.0.40
codegen_flags: <defaults>
</compile_context>

<pallas_src>
import jax
import jax.numpy as jnp
from jax.experimental import pallas as pl
from jax.experimental.pallas import tpu as pltpu

LOG_PARA = 100.0   # cfg_data.LOG_PARA
POOL = 8           # kernel5 in build_loss (ones filter, stride 8)


def _crowd_counter_kernel(w_ref, img_ref, gt_ref, p_ref, pt_ref,
                          cm_ref, lcm_ref, loss_ref):
    PT = pt_ref[...]                                   # (W, W//8) f32
    P = p_ref[...]                                     # (TH//8, TH) f32

    # ---- stand-in CCN folded into the pooling stage ------------------------
    # P is a 0/1 matrix -> exact in bf16, and img is already bf16, so the
    # row-pooling matmuls are exact (f32 accumulation on the MXU).  The conv
    # weights are applied afterwards on the 8x-smaller pooled rows in f32.
    p_bf = P.astype(jnp.bfloat16)                      # tiny, exact
    r0 = jnp.dot(p_bf, img_ref[0], preferred_element_type=jnp.float32)
    r1 = jnp.dot(p_bf, img_ref[1], preferred_element_type=jnp.float32)
    r2 = jnp.dot(p_bf, img_ref[2], preferred_element_type=jnp.float32)
    rows = w_ref[0] * r0 + w_ref[1] * r1 + w_ref[2] * r2      # (TH//8, W) f32

    # rows @ PT completes the 8x8 stride-8 sum-pool; conv bias commutes with
    # the linear sum-pool so it is added once on the pooled output.
    cm = jnp.dot(rows, PT, preferred_element_type=jnp.float32)
    cm = cm + w_ref[3] * float(POOL * POOL)
    cm_ref[...] = cm                                   # (TH//8, W//8)

    # ---- build_loss: gt / LOG_PARA -> 8x8 sum-pool (scale after pooling) ----
    gt_rows = jnp.dot(P, gt_ref[...], preferred_element_type=jnp.float32)
    lcm = jnp.dot(gt_rows, PT, preferred_element_type=jnp.float32) * (1.0 / LOG_PARA)
    lcm_ref[...] = lcm

    # ---- per-grid-step partial |diff| sum (no shared accumulator) ----------
    part = jnp.sum(jnp.abs(cm - lcm))
    loss_ref[...] = jnp.full((1, 128), part, dtype=jnp.float32)   # lane-dense store


def _vmem_capacity_bytes():
    """Physical VMEM of the local chip (128 MiB v5e/v6e, 64 MiB per TC on v7x)."""
    try:
        cap = int(pltpu.get_tpu_info().vmem_capacity_bytes)
        if cap > 0:
            return cap
    except Exception:
        pass
    return 64 * 2**20          # conservative fallback (v7x per-TensorCore)


def _block_bytes(TH, W, C, img_b, gt_b):
    """Approximate VMEM footprint of one grid step (pipeline double-buffering
    of inputs/outputs, P/PT conservatively counted double-buffered too)."""
    THc, Wc = TH // POOL, W // POOL
    return (2 * (C * TH * W * img_b + TH * W * gt_b)          # img + gt tiles
            + 2 * (2 * THc * Wc + 128) * 4                    # cm, lcm, loss tiles
            + 2 * (THc * TH + W * Wc) * 4)                    # P, PT (resident)


def _pick_row_tile(H, W, C, max_rows, min_tiles, img_b, gt_b, vmem_cap):
    """Largest row tile TH that (a) divides H, (b) is a multiple of 64 so the
    pooled output stays sublane-aligned (TH//8 % 8 == 0), (c) is <= max_rows,
    (d) yields at least `min_tiles` tiles (keeps both v7x cores busy), and
    (e) fits the chip's VMEM with 1.5x headroom."""
    cap_rows = min(H, max(64, max_rows))
    candidates = [th for th in range(64, cap_rows + 1, 64)
                  if H % th == 0 and (H // th) >= min_tiles]
    for th in sorted(candidates, reverse=True):
        need = _block_bytes(th, W, C, img_b, gt_b)
        if need + need // 2 <= int(0.9 * vmem_cap):
            return th
    if candidates:
        return min(candidates)
    # TODO(synk): remainder-tile support for heights that are not a multiple of
    # 64; fall back to a single full-height tile (always layout-legal).
    return H


def crowd_counter_forward(img, gt_map, w, *, row_tile=512,
                          img_dtype=jnp.bfloat16, gt_dtype=jnp.float32):
    """img: (N, 3, H, W); gt_map: (N, H, W); w: (4,) = [w0, w1, w2, bias]."""
    N, C, H, W = img.shape
    if C != 3:
        raise ValueError("stand-in CCN expects 3 input channels")
    if H % POOL or W % POOL:
        raise ValueError("H and W must be divisible by 8 (stride-8 sum pooling)")

    img_b = jnp.dtype(img_dtype).itemsize
    gt_b = jnp.dtype(gt_dtype).itemsize
    vmem_cap = _vmem_capacity_bytes()

    # >= 2 grid steps for single-image batches so both v7x TensorCores are used.
    min_tiles = 1 if N >= 2 else 2
    TH = _pick_row_tile(H, W, C, row_tile, min_tiles, img_b, gt_b, vmem_cap)
    T = H // TH
    THc, Hc, Wc = TH // POOL, H // POOL, W // POOL

    # HBM-bandwidth bound: ship the image as bf16 (dominant stream); keep the
    # ground-truth densities in f32 for exact parity with the PyTorch loss path.
    img = img.astype(img_dtype)
    gt_map = gt_map.astype(gt_dtype)
    w = w.astype(jnp.float32)

    # Pooling matrices: P @ x @ PT == 8x8 sum-pool with stride 8.  Tile-local:
    # the same P works for every row tile because TH is a multiple of 8.
    P = (jnp.arange(THc)[:, None] == (jnp.arange(TH)[None, :] // POOL)).astype(jnp.float32)
    PT = ((jnp.arange(W)[:, None] // POOL) == jnp.arange(Wc)[None, :]).astype(jnp.float32)

    out_shapes = (
        jax.ShapeDtypeStruct((N, 1, Hc, Wc), jnp.float32),   # count_map
        jax.ShapeDtypeStruct((N, 1, Hc, Wc), jnp.float32),   # gt_lcm_5
        jax.ShapeDtypeStruct((N, T, 1, 128), jnp.float32),   # per-tile |diff| partial sums
    )

    grid_spec = pltpu.PrefetchScalarGridSpec(
        num_scalar_prefetch=0,
        grid=(N, T),
        in_specs=[
            pl.BlockSpec(memory_space=pltpu.MemorySpace.SMEM),            # w (4,)
            pl.BlockSpec((None, C, TH, W), lambda b, t: (b, 0, t, 0)),    # img row tile
            pl.BlockSpec((None, TH, W), lambda b, t: (b, t, 0)),          # gt  row tile
            pl.BlockSpec((THc, TH), lambda b, t: (0, 0)),                 # P  (resident)
            pl.BlockSpec((W, Wc), lambda b, t: (0, 0)),                   # P^T (resident)
        ],
        out_specs=[
            pl.BlockSpec((None, None, THc, Wc), lambda b, t: (b, 0, t, 0)),
            pl.BlockSpec((None, None, THc, Wc), lambda b, t: (b, 0, t, 0)),
            pl.BlockSpec((None, None, 1, 128), lambda b, t: (b, t, 0, 0)),
        ],
    )

    # Explicit scoped-VMEM budget from the actual block footprint, with 1.5x
    # headroom, capped just under the chip's physical capacity.
    blk = _block_bytes(TH, W, C, img_b, gt_b)
    vmem_limit = int(min(int(0.9 * vmem_cap), max(32 * 2**20, blk + blk // 2)))

    count_map, gt_lcm, loss_part = pl.pallas_call(
        _crowd_counter_kernel,
        out_shape=out_shapes,
        grid_spec=grid_spec,
        compiler_params=pltpu.CompilerParams(
            dimension_semantics=("parallel", "parallel"),
            vmem_limit_bytes=vmem_limit),
    )(w, img, gt_map, P, PT)

    # nn.L1Loss() default: mean reduction over count_map elements.
    loss_sum = loss_part[:, :, 0, 0].sum() / count_map.size
    loss_total = loss_sum            # SumLoss path: loss_total += loss_sum_all
    return count_map, gt_lcm, loss_total, loss_sum


def _reference(img, gt_map, w):
    N, C, H, W = img.shape
    Hc, Wc = H // POOL, W // POOL
    feat = jnp.einsum('c,nchw->nhw', w[:3], img) + w[3]
    cm = feat.reshape(N, Hc, POOL, Wc, POOL).sum(axis=(2, 4))[:, None]
    lcm = (gt_map / LOG_PARA).reshape(N, Hc, POOL, Wc, POOL).sum(axis=(2, 4))[:, None]
    loss = jnp.mean(jnp.abs(cm - lcm))
    return cm, lcm, loss


if __name__ == "__main__":
    key = jax.random.PRNGKey(0)
    k_img, k_gt = jax.random.split(key)

    N, C, H, W = 2, 3, 128, 128
    img = jax.random.normal(k_img, (N, C, H, W), dtype=jnp.float32)
    gt_map = jnp.abs(jax.random.normal(k_gt, (N, H, W), dtype=jnp.float32)) * 10.0

    # deterministic stand-in "CCN" parameters: [w0, w1, w2, bias]
    w = jnp.array([0.1, 0.2, 0.3, 0.05], dtype=jnp.float32)

    # row_tile=64 -> 2 row tiles per image: exercises the tiled, parallel grid.
    count_map, gt_lcm, loss_total, loss_sum = crowd_counter_forward(
        img, gt_map, w, row_tile=64)
    jax.block_until_ready(count_map)

    # Reference uses the same bf16-quantized image the kernel consumes (the
    # stand-in CCN is a TODO anyway); gt_map stays full f32, as in the kernel.
    img_q = img.astype(jnp.bfloat16).astype(jnp.float32)
    cm_ref, lcm_ref, loss_ref = _reference(img_q, gt_map, w)

    assert jnp.allclose(count_map, cm_ref, atol=1e-3, rtol=1e-3)
    assert jnp.allclose(gt_lcm, lcm_ref, atol=1e-3, rtol=1e-3)
    assert jnp.allclose(loss_sum, loss_ref, atol=1e-3, rtol=1e-3)

    print("KERNEL_OK")
</pallas_src>

<mosaic_0001>
module attributes {stable_mosaic.version = 11 : i64} {
  func.func @_crowd_counter_kernel(%arg0: i32, %arg1: i32, %arg2: memref<4xf32, #tpu.memory_space<smem>>, %arg3: memref<1x3x64x128xbf16, #tpu.memory_space<vmem>>, %arg4: memref<1x64x128xf32, #tpu.memory_space<vmem>>, %arg5: memref<8x64xf32, #tpu.memory_space<vmem>>, %arg6: memref<128x16xf32, #tpu.memory_space<vmem>>, %arg7: memref<1x1x8x16xf32, #tpu.memory_space<vmem>>, %arg8: memref<1x1x8x16xf32, #tpu.memory_space<vmem>>, %arg9: memref<1x1x1x128xf32, #tpu.memory_space<vmem>>) attributes {dimension_semantics = [#tpu.dimension_semantics<parallel>, #tpu.dimension_semantics<parallel>], iteration_bounds = array<i64: 2, 2>, scalar_prefetch = 0 : i64, scratch_operands = 0 : i64, tpu.core_type = #tpu.core_type<tc>, window_params = [{transform_indices = @transform_0, window_bounds = array<i64: 4>}, {transform_indices = @transform_1, window_bounds = array<i64: 1, 3, 64, 128>}, {transform_indices = @transform_2, window_bounds = array<i64: 1, 64, 128>}, {pipeline_mode = #tpu.pipeline_mode<synchronous>, transform_indices = @transform_3, window_bounds = array<i64: 8, 64>}, {pipeline_mode = #tpu.pipeline_mode<synchronous>, transform_indices = @transform_4, window_bounds = array<i64: 128, 16>}, {transform_indices = @transform_5, window_bounds = array<i64: 1, 1, 8, 16>}, {transform_indices = @transform_6, window_bounds = array<i64: 1, 1, 8, 16>}, {transform_indices = @transform_7, window_bounds = array<i64: 1, 1, 1, 128>}]} {
    %c0 = arith.constant 0 : index
    %c0_0 = arith.constant 0 : index
    %0 = vector.load %arg6[%c0, %c0_0] : memref<128x16xf32, #tpu.memory_space<vmem>>, vector<128x16xf32>
    %c0_1 = arith.constant 0 : index
    %c0_2 = arith.constant 0 : index
    %1 = vector.load %arg5[%c0_1, %c0_2] : memref<8x64xf32, #tpu.memory_space<vmem>>, vector<8x64xf32>
    %2 = arith.truncf %1 : vector<8x64xf32> to vector<8x64xbf16>
    %c0_3 = arith.constant 0 : index
    %c0_4 = arith.constant 0 : index
    %c0_5 = arith.constant 0 : index
    %c0_6 = arith.constant 0 : index
    %3 = vector.load %arg3[%c0_3, %c0_4, %c0_5, %c0_6] : memref<1x3x64x128xbf16, #tpu.memory_space<vmem>>, vector<1x1x64x128xbf16>
    %4 = vector.shape_cast %3 : vector<1x1x64x128xbf16> to vector<64x128xbf16>
    %cst = arith.constant dense<0.000000e+00> : vector<8x128xf32>
    %5 = tpu.matmul %2, %4, %cst {dimension_numbers = #tpu.dot_dimension_numbers<[1], [0], [0], [1], [0, 0, 1, 1], [], []>} : vector<8x64xbf16>, vector<64x128xbf16>, vector<8x128xf32> -> vector<8x128xf32>
    %c0_7 = arith.constant 0 : index
    %c1 = arith.constant 1 : index
    %c0_8 = arith.constant 0 : index
    %c0_9 = arith.constant 0 : index
    %6 = vector.load %arg3[%c0_7, %c1, %c0_8, %c0_9] : memref<1x3x64x128xbf16, #tpu.memory_space<vmem>>, vector<1x1x64x128xbf16>
    %7 = vector.shape_cast %6 : vector<1x1x64x128xbf16> to vector<64x128xbf16>
    %cst_10 = arith.constant dense<0.000000e+00> : vector<8x128xf32>
    %8 = tpu.matmul %2, %7, %cst_10 {dimension_numbers = #tpu.dot_dimension_numbers<[1], [0], [0], [1], [0, 0, 1, 1], [], []>} : vector<8x64xbf16>, vector<64x128xbf16>, vector<8x128xf32> -> vector<8x128xf32>
    %c0_11 = arith.constant 0 : index
    %c2 = arith.constant 2 : index
    %c0_12 = arith.constant 0 : index
    %c0_13 = arith.constant 0 : index
    %9 = vector.load %arg3[%c0_11, %c2, %c0_12, %c0_13] : memref<1x3x64x128xbf16, #tpu.memory_space<vmem>>, vector<1x1x64x128xbf16>
    %10 = vector.shape_cast %9 : vector<1x1x64x128xbf16> to vector<64x128xbf16>
    %cst_14 = arith.constant dense<0.000000e+00> : vector<8x128xf32>
    %11 = tpu.matmul %2, %10, %cst_14 {dimension_numbers = #tpu.dot_dimension_numbers<[1], [0], [0], [1], [0, 0, 1, 1], [], []>} : vector<8x64xbf16>, vector<64x128xbf16>, vector<8x128xf32> -> vector<8x128xf32>
    %c0_15 = arith.constant 0 : index
    %12 = memref.load %arg2[%c0_15] : memref<4xf32, #tpu.memory_space<smem>>
    %13 = vector.broadcast %12 : f32 to vector<8x128xf32>
    %14 = arith.mulf %13, %5 : vector<8x128xf32>
    %c1_16 = arith.constant 1 : index
    %15 = memref.load %arg2[%c1_16] : memref<4xf32, #tpu.memory_space<smem>>
    %16 = vector.broadcast %15 : f32 to vector<8x128xf32>
    %17 = arith.mulf %16, %8 : vector<8x128xf32>
    %18 = arith.addf %14, %17 : vector<8x128xf32>
    %c2_17 = arith.constant 2 : index
    %19 = memref.load %arg2[%c2_17] : memref<4xf32, #tpu.memory_space<smem>>
    %20 = vector.broadcast %19 : f32 to vector<8x128xf32>
    %21 = arith.mulf %20, %11 : vector<8x128xf32>
    %22 = arith.addf %18, %21 : vector<8x128xf32>
    %cst_18 = arith.constant dense<0.000000e+00> : vector<8x16xf32>
    %23 = tpu.matmul %22, %0, %cst_18 {dimension_numbers = #tpu.dot_dimension_numbers<[1], [0], [0], [1], [0, 0, 1, 1], [], []>} : vector<8x128xf32>, vector<128x16xf32>, vector<8x16xf32> -> vector<8x16xf32>
    %c3 = arith.constant 3 : index
    %24 = memref.load %arg2[%c3] : memref<4xf32, #tpu.memory_space<smem>>
    %cst_19 = arith.constant 6.400000e+01 : f32
    %25 = arith.mulf %24, %cst_19 : f32
    %26 = vector.broadcast %25 : f32 to vector<8x16xf32>
    %27 = arith.addf %23, %26 : vector<8x16xf32>
    %c0_20 = arith.constant 0 : index
    %c0_21 = arith.constant 0 : index
    %c0_22 = arith.constant 0 : index
    %c0_23 = arith.constant 0 : index
    %28 = vector.load %arg7[%c0_20, %c0_21, %c0_22, %c0_23] : memref<1x1x8x16xf32, #tpu.memory_space<vmem>>, vector<1x1x8x16xf32>
    %29 = vector.shape_cast %28 : vector<1x1x8x16xf32> to vector<8x16xf32>
    %30 = vector.shape_cast %27 : vector<8x16xf32> to vector<1x1x8x16xf32>
    tpu.vector_store %arg7[%c0_20, %c0_21, %c0_22, %c0_23], %30 {strides = array<i32>} : memref<1x1x8x16xf32, #tpu.memory_space<vmem>>, vector<1x1x8x16xf32>,
    %c0_24 = arith.constant 0 : index
    %c0_25 = arith.constant 0 : index
    %c0_26 = arith.constant 0 : index
    %31 = vector.load %arg4[%c0_24, %c0_25, %c0_26] : memref<1x64x128xf32, #tpu.memory_space<vmem>>, vector<1x64x128xf32>
    %32 = vector.shape_cast %31 : vector<1x64x128xf32> to vector<64x128xf32>
    %cst_27 = arith.constant dense<0.000000e+00> : vector<8x128xf32>
    %33 = tpu.matmul %1, %32, %cst_27 {dimension_numbers = #tpu.dot_dimension_numbers<[1], [0], [0], [1], [0, 0, 1, 1], [], []>} : vector<8x64xf32>, vector<64x128xf32>, vector<8x128xf32> -> vector<8x128xf32>
    %cst_28 = arith.constant dense<0.000000e+00> : vector<8x16xf32>
    %34 = tpu.matmul %33, %0, %cst_28 {dimension_numbers = #tpu.dot_dimension_numbers<[1], [0], [0], [1], [0, 0, 1, 1], [], []>} : vector<8x128xf32>, vector<128x16xf32>, vector<8x16xf32> -> vector<8x16xf32>
    %cst_29 = arith.constant 0.00999999977 : f32
    %35 = vector.broadcast %cst_29 : f32 to vector<8x16xf32>
    %36 = arith.mulf %34, %35 : vector<8x16xf32>
    %c0_30 = arith.constant 0 : index
    %c0_31 = arith.constant 0 : index
    %c0_32 = arith.constant 0 : index
    %c0_33 = arith.constant 0 : index
    %37 = vector.load %arg8[%c0_30, %c0_31, %c0_32, %c0_33] : memref<1x1x8x16xf32, #tpu.memory_space<vmem>>, vector<1x1x8x16xf32>
    %38 = vector.shape_cast %37 : vector<1x1x8x16xf32> to vector<8x16xf32>
    %39 = vector.shape_cast %36 : vector<8x16xf32> to vector<1x1x8x16xf32>
    tpu.vector_store %arg8[%c0_30, %c0_31, %c0_32, %c0_33], %39 {strides = array<i32>} : memref<1x1x8x16xf32, #tpu.memory_space<vmem>>, vector<1x1x8x16xf32>,
    %40 = arith.subf %27, %36 : vector<8x16xf32>
    %41 = math.absf %40 : vector<8x16xf32>
    %42 = vector.shape_cast %41 : vector<8x16xf32> to vector<1x8x16xf32>
    %cst_34 = arith.constant dense<0.000000e+00> : vector<1xf32>
    %43 = vector.multi_reduction <add>, %42, %cst_34 [1, 2] : vector<1x8x16xf32> to vector<1xf32>
    %44 = vector.shape_cast %43 : vector<1xf32> to vector<1x1x1xf32>
    %45 = vector.extract %44[0, 0, 0] : f32 from vector<1x1x1xf32>
    %46 = vector.broadcast %45 : f32 to vector<1x128xf32>
    %c0_35 = arith.constant 0 : index
    %c0_36 = arith.constant 0 : index
    %c0_37 = arith.constant 0 : index
    %c0_38 = arith.constant 0 : index
    %47 = vector.load %arg9[%c0_35, %c0_36, %c0_37, %c0_38] : memref<1x1x1x128xf32, #tpu.memory_space<vmem>>, vector<1x1x1x128xf32>
    %48 = vector.shape_cast %47 : vector<1x1x1x128xf32> to vector<1x128xf32>
    %49 = vector.shape_cast %46 : vector<1x128xf32> to vector<1x1x1x128xf32>
    tpu.vector_store %arg9[%c0_35, %c0_36, %c0_37, %c0_38], %49 {strides = array<i32>} : memref<1x1x1x128xf32, #tpu.memory_space<vmem>>, vector<1x1x1x128xf32>,
    return
  }
  func.func @transform_0(%arg0: i32, %arg1: i32) -> i32 {
    %c0_i32 = arith.constant 0 : i32
    %c0_i32_0 = arith.constant 0 : i32
    return %c0_i32 : i32
  }
  func.func @transform_1(%arg0: i32, %arg1: i32) -> (i32, i32, i32, i32) {
    %c0_i32 = arith.constant 0 : i32
    %c0_i32_0 = arith.constant 0 : i32
    %c0_i32_1 = arith.constant 0 : i32
    return %arg0, %c0_i32, %arg1, %c0_i32_0 : i32, i32, i32, i32
  }
  func.func @transform_2(%arg0: i32, %arg1: i32) -> (i32, i32, i32) {
    %c0_i32 = arith.constant 0 : i32
    %c0_i32_0 = arith.constant 0 : i32
    return %arg0, %arg1, %c0_i32 : i32, i32, i32
  }
  func.func @transform_3(%arg0: i32, %arg1: i32) -> (i32, i32) {
    %c0_i32 = arith.constant 0 : i32
    %c0_i32_0 = arith.constant 0 : i32
    %c0_i32_1 = arith.constant 0 : i32
    return %c0_i32, %c0_i32_0 : i32, i32
  }
  func.func @transform_4(%arg0: i32, %arg1: i32) -> (i32, i32) {
    %c0_i32 = arith.constant 0 : i32
    %c0_i32_0 = arith.constant 0 : i32
    %c0_i32_1 = arith.constant 0 : i32
    return %c0_i32, %c0_i32_0 : i32, i32
  }
  func.func @transform_5(%arg0: i32, %arg1: i32) -> (i32, i32, i32, i32) {
    %c0_i32 = arith.constant 0 : i32
    %c0_i32_0 = arith.constant 0 : i32
    %c0_i32_1 = arith.constant 0 : i32
    return %arg0, %c0_i32, %arg1, %c0_i32_0 : i32, i32, i32, i32
  }
  func.func @transform_6(%arg0: i32, %arg1: i32) -> (i32, i32, i32, i32) {
    %c0_i32 = arith.constant 0 : i32
    %c0_i32_0 = arith.constant 0 : i32
    %c0_i32_1 = arith.constant 0 : i32
    return %arg0, %c0_i32, %arg1, %c0_i32_0 : i32, i32, i32, i32
  }
  func.func @transform_7(%arg0: i32, %arg1: i32) -> (i32, i32, i32, i32) {
    %c0_i32 = arith.constant 0 : i32
    %c0_i32_0 = arith.constant 0 : i32
    %c0_i32_1 = arith.constant 0 : i32
    return %arg0, %arg1, %c0_i32, %c0_i32_0 : i32, i32, i32, i32
  }
}

</mosaic_0001>

<bundles_post_ra>
// kernel: tpu_custom_call.1
= control target key start
LH: loop header
LB: loop body
LE: loop exit
PB: predicated region body
PF: predicated region fallthrough
CT: control target
= control target key end

     0   :  { %s2292_s0 = inlined_call_operand.vmem [shape: f32[4], index: 0, kind: input, shape index: {}]   ;;  %s2293_s1 = inlined_call_operand.hbm [shape: bf16[2,3,128,128], index: 1, kind: input, shape index: {}]   ;;  %s2294_s2 = inlined_call_operand.hbm [shape: f32[2,128,128], index: 2, kind: input, shape index: {}]   ;;  %s2295_s3 = inlined_call_operand.vmem [shape: f32[8,64], index: 3, kind: input, shape index: {}]   ;;  %s2296_s4 = inlined_call_operand.vmem [shape: f32[128,16], index: 4, kind: input, shape index: {}]   ;;  %s2297_s5 = inlined_call_operand.hbm [shape: f32[2,1,16,16], index: 5, kind: output, shape index: {0}]   ;;  %s2298_s6 = inlined_call_operand.hbm [shape: f32[2,1,16,16], index: 6, kind: output, shape index: {1}]   ;;  %s2299_s7 = inlined_call_operand.hbm [shape: f32[2,2,1,128], index: 7, kind: output, shape index: {2}]  }
   0x1   :  { %2317 = sst [smem:[#allocation29_spill]] %s2292_s0 }
   0x2   :  { %2318 = sst [smem:[#allocation30_spill]] %s2297_s5 }
   0x3   :  { %2319 = sst [smem:[#allocation31_spill]] %s2298_s6 }
   0x4   :  { %2320 = sst [smem:[#allocation32_spill]] %s2299_s7 }
   0x5   :  { %13 = vsyncpa [#allocation5], 0 }
   0x6   :  { %14 = vsyncpa [#allocation3], 0 }
   0x7   :  { %16 = vsyncpa [#allocation3 + $0x1], 0 }
   0x8   :  { %17 = vsyncpa [#allocation8], 0 }
   0x9   :  { %19 = vsyncpa [#allocation8 + $0x1], 0 }
   0xa   :  { %20 = vsyncpa [#allocation4], 0 }
   0xb   :  { %22 = vsyncpa [#allocation4 + $0x1], 0 }
   0xc   :  { %23 = vsyncpa [#allocation11], 0 }
   0xd   :  { %25 = vsyncpa [#allocation11 + $0x1], 0  ;;  %s1859_s24 = smov 0   ;;  %s1861_s25 = smov 0  }
   0xe   :  { %s1863_s26 = smov 0   ;;  %s1865_s27 = smov 0  }
   0xf   :  { %s1867_s28 = smov 0   ;;  %s1869_s29 = smov 0  }
  0x10   :  { %s1871_s30 = smov 0   ;;  %s1873_s8 = smov 0  }
  0x11 LB: > { %2321 = sst [smem:[#allocation21_spill]] %s1773_s24  ;;  %s1900_s9 = sadd.s32 4294967295, %s1801_s8   ;;  %s1801_s8 = sphi %s1873_s8, %s31_s8   ;;  %s1797_s30 = sphi %s1871_s30, %s2359_s30   ;;  %s1793_s29 = sphi %s1869_s29, %s2358_s29   ;;  %s1789_s28 = sphi %s1867_s28, %s2357_s28   ;;  %s1785_s27 = sphi %s1865_s27, %s2356_s27   ;;  %s1781_s26 = sphi %s1863_s26, %s2351_s26   ;;  %s1777_s25 = sphi %s1861_s25, %s2355_s25   ;;  %s1773_s24 = sphi %s1859_s24, %s2354_s24  }
  0x12   : > { %2322 = sst [smem:[#allocation22_spill]] %s1781_s26  ;;  %s2304_s10 = sadd.s32 4294967294, %s1801_s8  }
  0x13   : > { %2323 = sst [smem:[#allocation23_spill]] %s1801_s8  ;;  %s40_s11 = sadd.s32 1, %s1793_s29 }
  0x14   : > { %s43_s12 = sadd.s32 1, %s1797_s30  ;;  %p41_p0 = scmp.ge.s32.totalorder %s40_s11, 2 }
  0x15   : > { %s73_s13 = sadd.s32 1, %s1781_s26  ;;  %p80_p1 = scmp.ne.s32.totalorder %s1781_s26, %s1777_s25 }
  0x16   : > { %p81_p2 = scmp.eq.s32.totalorder %s1801_s8, 0  ;;  %s2361_s11 = smov (%p41_p0, %s40_s11), 0 }
  0x17   : > { %2324 = sst [smem:[#allocation24_spill]] %s2361_s11  ;;  %s2363_s12 = smov (!%p41_p0, %s43_s12), %s1797_s30 }
  0x18   : > { %s69_s14 = ssub.s32 %s1793_s29, %s2361_s11  ;;  %p1914_p3 = por %p81_p2, %p80_p1 }
  0x19   : > { %p45_p4 = scmp.ge.s32.totalorder %s2363_s12, 2  ;;  %p86_p5 = scmp.ne.s32.totalorder %s1777_s25, %s1773_s24 }
  0x1a   : > { %p2316_p6 = scmp.eq.s32.totalorder %s1900_s9, 0  ;;  %p182_p7 = scmp.eq.s32.totalorder %s1900_s9, 3 }
  0x1b   : > { %s2365_s12 = smov (%p45_p4, %s2363_s12), 0  ;;  %p188_p10 = scmp.eq.s32.totalorder %s2304_s10, 3 }
  0x1c   : > { %2326 = sst [smem:[#allocation25_spill]] %s2365_s12  ;;  %p1926_p8 = por %p2316_p6, %p86_p5 }
  0x1d   : > { %p1930_p9 = por %p182_p7, %p80_p1  ;;  %s68_s18 = ssub.s32 %s1797_s30, %s2365_s12 }
  0x1e   : > { %s2327_s16 = scalar_select %p1926_p8, 1, 0 }
  0x1f   : > { %s2328_s17 = scalar_select %p1930_p9, 1, 0 }
  0x20   : > { %s70_s19 = sor.u32 %s69_s14, %s68_s18  ;;  %p1157_p11 = scmp.ge.s32.totalorder %s1801_s8, 1 }
  0x21   : > { %2329 = sst [smem:[#allocation26_spill]] %s2328_s17  ;;  %p71_p12 = scmp.eq.s32.totalorder %s70_s19, 0 }
  0x22   : > { %p1939_p13 = por %p188_p10, %p86_p5  ;;  %p251_p0 = scmp.lt.s32.totalorder %s1801_s8, 5 }
  0x23   : > { %s1945_s21 = scalar_select %p71_p12, %s1781_s26, %s73_s13  }
  0x24   : > { %s2330_s20 = scalar_select %p1939_p13, 1, 0 }
  0x25   : > { %2332 = sst [smem:[#allocation28_spill]] %s1945_s21  ;;  %p1947_p2 = pnand %p1157_p11, %p251_p0 }
  0x26   : > { %2331 = sst [smem:[#allocation27_spill]] %s2330_s20  ;;  %s2334_s0 = sld [smem:[#allocation29_spill]] }
  0x27   : > { %p1487_p1 = pneg %p1947_p2 }
  0x29   : > { %p1488_p4 = pnand %p1487_p1, %p2316_p6 }
  0x2b   : > { %p1594_p7 = pneg %p1488_p4 }
  0x2c   : > { %s264_s12 = sshll.u32 %s2334_s0, 4  ;;  %s265_s12 = int_to_ptr.vmem [resolvable:$true] %s264_s12 }
  0x2d   : > { %s1592_s14 = scalar_lea.vmem %s265_s12, 16  ;;  %p1600_p13 = scmp.lt.s32.totalorder %s265_s12, %s265_s12 }
  0x2e   : > { %p1593_p5 = scmp.ne.s32.totalorder %s265_s12, %s1592_s14  ;;  %p1601_p11 = scmp.lt.s32.totalorder %s1592_s14, %s1592_s14 }
  0x30   : > { %p1595_p10 = pnand %p1594_p7, %p1593_p5  ;;  %p1602_p0 = por %p1601_p11, %p1600_p13 }
  0x32   : > { %p1596_p12 = pneg %p1595_p10 }
  0x34   : > { %p1603_p9 = pnand %p1602_p0, %p1596_p12 }
  0x36   : > { %1606 = shalt.err (!%p1603_p9)
}
  0x37   : > { %s1803_s13 = smov [#allocation2]   ;;  %p1159_p8 = scmp.ge.s32.totalorder %s1801_s8, 4 }
  0x38   : > { %1490 = dma.vmem_to_smem (!%p1488_p4), %s265_s12, 16, %s1803_s13, [#allocation5]  }
  0x39   : > { %277 = sbr.rel (%p1159_p8) target bundleno = 106 (0x6a), region = 28 }
  0x40   : > { %s1960_s11 = sand.u32 1, %s1781_s26   ;;  %s2310_s19 = sshll.u32 %s1793_s29, 3 }
  0x41   : > { %s1461_s18 = smul.u32 96, %s1960_s11  ;;  %s1804_s12 = smov 1024  }
  0x42   : > { %s1462_s23 = smul.u32 48, %s1797_s30  ;;  %1469 = sst [smem:[#allocation14]] (%p1914_p3), %s1804_s12 }
  0x43   : > { %s285_s13 = scalar_lea.vmem [#allocation6], %s1461_s18  ;;  %s1805_s21 = smov 512  }
  0x44   : > { %s291_s14 = sadd.s32 %s1462_s23, %s2310_s19  ;;  %s306_s10 = sshll.u32 %s285_s13, 4  ;;  %s307_s10 = int_to_ptr.vmem [resolvable:$true] %s306_s10 }
  0x45   : > { %s1468_s0 = scalar_select %p1914_p3, [#allocation0], [#allocation15] }
  0x46   : > { %1470 = sst [smem:[#allocation14 + $0x1]] (%p1914_p3), %s1805_s21  ;;  %s1806_s20 = smov 8  }
  0x47   : > { %s298_s26 = sld [smem:[%s1468_s0]]   ;;  %s1161_s24 = sshll.u32 %s291_s14, 6 }
  0x48   : > { %1471 = sst [smem:[#allocation14 + $0x2]] (%p1914_p3), %s1806_s20  ;;  %s1807_s8 = smov 64  }
  0x49   : > { %1472 = sst [smem:[#allocation14 + $0x3]] (%p1914_p3), %s1807_s8  ;;  %s1808_s18 = smov 4  }
  0x4a   : > { %1473 = sst [smem:[#allocation14 + $0x4]] (%p1914_p3), %s1807_s8  ;;  %s293_s13 = scalar_lea.hbm %s2293_s1, %s1161_s24 }
  0x4b   : > { %1474 = sst [smem:[#allocation14 + $0x5]] (%p1914_p3), %s1808_s18  ;;  %s282_s0 = scalar_lea.sflag [#allocation3], %s1960_s11 }
  0x4c   : > { %s1809_s7 = smov [#allocation13]   ;;  %s1164_s8 = sshll.u32 %s1960_s11, 6 }
  0x4d   : > { %s1162_s21 = sshll.u32 %s298_s26, 26  ;;  %s1166_s20 = sshll.u32 %s1797_s30, 4 }
  0x4e   : > { %s1163_s19 = sadd.s32 134217728, %s1162_s21  ;;  %s2335_s14 = sshll.u32 %s1793_s29, 3 }
  0x4f   : > { %1475 = dma.general (%p1914_p3), %s293_s13, 1536, %s307_s10, %s282_s0, %s1809_s7, [#allocation14], %s1163_s19, 0  }
  0x50   : > { %s339_s5 = sadd.s32 %s1166_s20, %s2335_s14  ;;  %s333_s18 = scalar_lea.vmem [#allocation7], %s1164_s8 }
  0x51   : > { %s342_s6 = sshll.u32 %s333_s18, 4  ;;  %s1167_s17 = sshll.u32 %s339_s5, 7  ;;  %s1991_s6 = int_to_ptr.vmem [resolvable:$true] %s342_s6 }
  0x52   : > { %s1996_s23 = scalar_lea.hbm %s2294_s2, %s1167_s17  ;;  %s330_s7 = scalar_lea.sflag [#allocation8], %s1960_s11 }
  0x53   : > { %s1607_s10 = scalar_lea.hbm %s1996_s23, 1024  ;;  %s1611_s5 = scalar_lea.hbm %s2294_s2, 4096 }
  0x54   : > { %p1608_p8 = scmp.ne.s32.totalorder %s1996_s23, %s1607_s10  ;;  %p1612_p1 = scmp.lt.u32.totalorder %s1996_s23, %s2294_s2 }
  0x55   : > { %p1613_p4 = scmp.lt.u32.totalorder %s1611_s5, %s1607_s10  ;;  %p1615_p7 = scmp.lt.u32.totalorder %s1607_s10, %s1996_s23 }
  0x56   : > { %p1609_p9 = pnand %p1608_p8, %p1914_p3 }
  0x57   : > { %p1614_p5 = por %p1613_p4, %p1612_p1 }
  0x58   : > { %p1610_p13 = pneg %p1609_p9 }
  0x59   : > { %p1616_p10 = por %p1615_p7, %p1614_p5 }
  0x5b   : > { %p1617_p12 = pnand %p1616_p10, %p1610_p13 }
  0x5d   : > { %1620 = shalt.err (!%p1617_p12)
}
  0x5e   : > { %s1621_s17 = scalar_lea.vmem %s1991_s6, 1024  ;;  %s1810_s0 = smov [#allocation7]  }
  0x5f   : > { %p1622_p11 = scmp.ne.s32.totalorder %s1991_s6, %s1621_s17  ;;  %s1625_s8 = sshll.u32 %s1810_s0, 4  ;;  %s1626_s8 = int_to_ptr.vmem [resolvable:$false] %s1625_s8 }
  0x60   : > { %s1627_s20 = scalar_lea.vmem %s1626_s8, 2048  ;;  %p1628_p9 = scmp.lt.s32.totalorder %s1991_s6, %s1626_s8 }
  0x61   : > { %p1623_p0 = pnand %p1622_p11, %p1914_p3  ;;  %p1629_p6 = scmp.lt.s32.totalorder %s1627_s20, %s1621_s17 }
  0x63   : > { %p1624_p8 = pneg %p1623_p0  ;;  %p1630_p1 = por %p1629_p6, %p1628_p9 }
  0x65   : > { %p1631_p4 = pnand %p1630_p1, %p1624_p8 }
  0x67   : > { %1634 = shalt.err (!%p1631_p4)
}
  0x68   : > { %s1811_s14 = smov 128   ;;  %s1812_s18 = smov 8  }
  0x69   : > { %1476 = dma.hbm_to_vmem [thread:$0]  (%p1914_p3), %s1996_s23, 1024, %s1991_s6, %s330_s7, %s1811_s14, %s1811_s14, %s1812_s18  }
  0x6a PF: > { %354 = sbr.rel (%p1947_p2) target bundleno = 813 (0x32d), region = 40  ;;  %p2336_p13 = scmp.eq.s32.totalorder (!%p1947_p2), %s1900_s9, 0 }
  0x71   : > { %1752 = dma.done.wait (%p2336_p13), [#allocation5], 16   ;;  %p2337_p6 = pmov %p2336_p13 }
  0x72   : > { %s2029_s24 = sand.u32 1, %s1777_s25   ;;  %p2338_p3 = scmp.ne.s32.totalorder %s2327_s16, 0 }
  0x73   : > { %1754 = vsyncadd (%p2337_p6), [#allocation5], 4294967280  ;;  %s1463_s26 = smul.u32 96, %s2029_s24  ;;  %s361_s15 = scalar_lea.sflag [#allocation3], %s2029_s24 }
  0x75   : > { %s2033_s11 = scalar_lea.vmem [#allocation6], %s1463_s26 }
  0x76   : > { %1756 = dma.done.wait (%p2338_p3), %s361_s15, 1536  }
  0x77   : > { %1758 = vsyncadd (%p2338_p3), %s361_s15, 4294965760  ;;  %s1170_s6 = sshll.u32 %s2029_s24, 6  ;;  %s370_s22 = scalar_lea.sflag [#allocation8], %s2029_s24 }
  0x78   : > { %s2041_s23 = scalar_lea.vmem [#allocation7], %s1170_s6 }
  0x79   : > { %1760 = dma.done.wait (%p2338_p3), %s370_s22, 1024  }
  0x7a   : > { %1762 = vsyncadd (%p2338_p3), %s370_s22, 4294966272 }
  0x7b   : > { %378 = sfence }
  0x7c   : > { %v1580_v0 = vld [vmem:[%s2033_s11] sm:$0xff]   ;;  %v1813_v1 = vmov 0.0   ;;  %v1581_v2 = vld [vmem:[%s2033_s11 + $0x8] sm:$0xff]   ;;  %vm1814_vm0 = vmmov 0   ;;  %v1583_v5 = vld [vmem:[%s2033_s11 + $0x10] sm:$0xff]   ;;  %vm472_vm1 = vcmask 523264  }
  0x7d   : > { %1276 = vmatprep.subr.bf16.mxu1 %v1813_v1  ;;  %1300 = vmatprep.subr.bf16.mxu0 %v1813_v1  ;;  %v1582_v3 = vld [vmem:[%s2033_s11 + $0x40] sm:$0xff]   ;;  %v1584_v4 = vld [vmem:[%s2033_s11 + $0x48] sm:$0xff]   ;;  %v1586_v6 = vld [vmem:[%s2033_s11 + $0x50] sm:$0xff]   ;;  %v1815_v15 = vmov 0.0|0.0   ;;  %s662_s26 = sld [smem:[#allocation2]]  ;;  %s1204_s15 = sld [smem:[#allocation2 + $0x1]] }
  0x7e   : > { %1277 = vmatpush3.bf16.msra.mxu1 %v1580_v0  ;;  %1284 = vmatprep.mubr.msk.bf16.mxu1 %vm1814_vm0, %v1813_v1  ;;  %v1585_v7 = vld [vmem:[%s2033_s11 + $0x18] sm:$0xff]   ;;  %v438_v8 = vld [vmem:[%s2295_s3] sm:$0xff]  ;;  %v749_v12 = vld [vmem:[%s2041_s23 + $0x8] sm:$0xff]  ;;  %s1206_s6 = sld [smem:[#allocation2 + $0x3]]  ;;  %s1171_s22 = sshll.u32 %s2029_s24, 3  ;;  %vm746_vm2 = vcmask 130048  }
  0x7f   : > { %1278 = vmatprep.subr.bf16.mxu1 %v1813_v1  ;;  %1308 = vmatprep.mubr.msk.bf16.mxu0 %vm1814_vm0, %v1813_v1  ;;  %v1588_v9 = vld [vmem:[%s2033_s11 + $0x58] sm:$0xff]   ;;  %v439_v10 = vpack.c.bf16 %v438_v8, %v438_v8  ;;  %v748_v11 = vld [vmem:[%s2041_s23] sm:$0xff]  ;;  %v750_v16 = vld [vmem:[%s2041_s23 + $0x10] sm:$0xff]  ;;  %s412_s16 = scalar_lea.vmem [#allocation10], %s1171_s22  ;;  %s2167_s7 = scalar_lea.vmem [#allocation9], %s1171_s22 }
  0x80   : > { %1301 = vmatpush3.bf16.msra.mxu0 %v1582_v3  ;;  %v1587_v13 = vld [vmem:[%s2033_s11 + $0x20] sm:$0xff]   ;;  %v1426_v14 = vpack.c.bf16 %v749_v12, %v748_v11  ;;  %v751_v17 = vld [vmem:[%s2041_s23 + $0x18] sm:$0xff]  ;;  %v1589_v18 = vld [vmem:[%s2033_s11 + $0x28] sm:$0xff]   ;;  %s2339_s10 = sld [smem:[#allocation26_spill]]  ;;  %s1210_s19 = sshll.u32 %s1789_s28, 1 }
  0x81   : > { %1302 = vmatprep.subr.bf16.mxu0 %v1813_v1  ;;  %v1429_v19 = vpack.c.bf16 %v751_v17, %v750_v16  ;;  %v752_v20 = vld [vmem:[%s2041_s23 + $0x20] sm:$0xff]  ;;  %v753_v21 = vld [vmem:[%s2041_s23 + $0x28] sm:$0xff]  ;;  %v1590_v22 = vld [vmem:[%s2033_s11 + $0x30] sm:$0xff]   ;;  %s2172_s12 = sadd.s32 %s1785_s27, %s1210_s19  ;;  %s920_s5 = sand.u32 1, %s1900_s9  }
  0x82   : > { %1279 = vmatpush3.bf16.msra.mxu1 %v1581_v2  ;;  %v1432_v23 = vpack.c.bf16 %v753_v21, %v752_v20  ;;  %v754_v24 = vld [vmem:[%s2041_s23 + $0x30] sm:$0xff]  ;;  %v755_v25 = vld [vmem:[%s2041_s23 + $0x38] sm:$0xff]  ;;  %v422_v27 = vld [vmem:[%s2296_s4] sm:$0xff]  ;;  %s1211_s13 = sshll.u32 %s2172_s12, 7  ;;  %s2340_s0 = sld [smem:[#allocation31_spill]] }
  0x83   : > { %1280 = vmatprep.subr.bf16.mxu1 %v1813_v1  ;;  %v1591_v26 = vld [vmem:[%s2033_s11 + $0x38] sm:$0xff]   ;;  %v423_v28 = vld [vmem:[%s2296_s4 + $0x8] sm:$0xff]  ;;  %v1435_v29 = vpack.c.bf16 %v755_v25, %v754_v24  ;;  %v424_v31 = vld [vmem:[%s2296_s4 + $0x10] sm:$0xff]  ;;  %s1205_s11 = sld [smem:[#allocation2 + $0x2]]  ;;  %v663_v60 = vstv %s662_s26  ;;  %s955_s20 = sshll.u32 %s412_s16, 4  ;;  %s2181_s20 = int_to_ptr.vmem [resolvable:$true] %s955_s20 }
  0x84   : > { %1303 = vmatpush3.bf16.msra.mxu0 %v1584_v4  ;;  %v1402_v30 = vpack.c.bf16 %v423_v28, %v422_v27  ;;  %v425_v32 = vld [vmem:[%s2296_s4 + $0x18] sm:$0xff]  ;;  %v426_v34 = vld [vmem:[%s2296_s4 + $0x20] sm:$0xff]  ;;  %v427_v35 = vld [vmem:[%s2296_s4 + $0x28] sm:$0xff]  ;;  %v666_v61 = vstv %s1204_s15  ;;  %s674_s23 = smul.f32 64.0, %s1206_s6  ;;  %s2341_s26 = sld [smem:[#allocation30_spill]] }
  0x85   : > { %1304 = vmatprep.subr.bf16.mxu0 %v1813_v1  ;;  %v1405_v33 = vpack.c.bf16 %v425_v32, %v424_v31  ;;  %v1408_v36 = vpack.c.bf16 %v427_v35, %v426_v34  ;;  %v428_v37 = vld [vmem:[%s2296_s4 + $0x30] sm:$0xff]  ;;  %v429_v38 = vld [vmem:[%s2296_s4 + $0x38] sm:$0xff]  ;;  %v430_v40 = vld [vmem:[%s2296_s4 + $0x40] sm:$0xff]  ;;  %s2188_s27 = scalar_lea.sflag [#allocation11], %s920_s5  ;;  %s1635_s9 = scalar_lea.vmem %s2181_s20, 128 }
  0x86   : > { %1281 = vmatpush3.bf16.msra.mxu1 %v1583_v5  ;;  %v1411_v39 = vpack.c.bf16 %v429_v38, %v428_v37  ;;  %v431_v41 = vld [vmem:[%s2296_s4 + $0x48] sm:$0xff]  ;;  %v432_v43 = vld [vmem:[%s2296_s4 + $0x50] sm:$0xff]  ;;  %v433_v44 = vld [vmem:[%s2296_s4 + $0x58] sm:$0xff]  ;;  %p1636_p2 = scmp.ne.s32.totalorder %s2181_s20, %s1635_s9  ;;  %p2343_p5 = scmp.ne.s32.totalorder %s2339_s10, 0 }
  0x87   : > { %1282 = vmatprep.subr.bf16.mxu1 %v1813_v1  ;;  %v1414_v42 = vpack.c.bf16 %v431_v41, %v430_v40  ;;  %v1417_v45 = vpack.c.bf16 %v433_v44, %v432_v43  ;;  %v434_v46 = vld [vmem:[%s2296_s4 + $0x60] sm:$0xff]  ;;  %v435_v47 = vld [vmem:[%s2296_s4 + $0x68] sm:$0xff]  ;;  %v436_v49 = vld [vmem:[%s2296_s4 + $0x70] sm:$0xff] }
  0x88   : > { %1305 = vmatpush3.bf16.msra.mxu0 %v1586_v6  ;;  %v1420_v48 = vpack.c.bf16 %v435_v47, %v434_v46  ;;  %v437_v50 = vld [vmem:[%s2296_s4 + $0x78] sm:$0xff]  ;;  %s2179_s8 = scalar_lea.hbm %s2340_s0, %s1211_s13  ;;  %p1637_p7 = pnand %p1636_p2, %p2343_p5 }
  0x89   : > { %1306 = vmatprep.subr.bf16.mxu0 %v1813_v1  ;;  %v1423_v51 = vpack.c.bf16 %v437_v50, %v436_v49  ;;  %v670_v62 = vstv %s1205_s11  ;;  %s1816_s11 = smov [#allocation10]  }
  0x8a   : > { %1283 = vmatpush3.bf16.msra.mxu1 %v1585_v7  ;;  %s2342_s15 = smov %s2341_s26  ;;  %s2186_s28 = scalar_lea.hbm %s2341_s26, %s1211_s13 }
  0x8b   : > { %1288 = vmatprep.subr.bf16.mxu1 %v1813_v1  ;;  %p1638_p10 = pneg %p1637_p7  ;;  %s1639_s6 = sshll.u32 %s1816_s11, 4  ;;  %s1640_s6 = int_to_ptr.vmem [resolvable:$false] %s1639_s6 }
  0x8c   : > { %1307 = vmatpush3.bf16.msra.mxu0 %v1588_v9  ;;  %s1641_s22 = scalar_lea.vmem %s1640_s6, 256  ;;  %p1642_p12 = scmp.lt.s32.totalorder %s2181_s20, %s1640_s6 }
  0x8d   : > { %1285 = vmatmul.mubr.msk.bf16.vlgmr.msra.gmra.mrb[0].mxu1 %vm472_vm1, %v439_v10  ;;  %1425 = vmatprep.subr.bf16.mxu0 %v1815_v15  ;;  %p1643_p11 = scmp.lt.s32.totalorder %s1641_s22, %s1635_s9 }
  0x8e   : > { %1289 = vmatpush3.bf16.msra.mxu1 %v1587_v13  ;;  %1296 = vmatprep.mubr.msk.bf16.mxu1 %vm1814_vm0, %v1813_v1  ;;  %v675_v13 = vstv %s674_s23 }
  0x8f   : > { %1290 = vmatprep.subr.bf16.mxu1 %v1813_v1  ;;  %1309 = vmatmul.mubr.msk.bf16.vlgmr.msra.gmra.mrb[0].mxu0 %vm472_vm1, %v439_v10  ;;  %p1644_p0 = por %p1643_p11, %p1642_p12 }
  0x90   : > { %1427 = vmatpush3.bf16.msra.mxu0 %v1426_v14  ;;  %1363 = vmatprep.mubr.msk.f32.mxu0 %vm1814_vm0, %v1813_v1 }
  0x91   : > { %1428 = vmatprep.subr.bf16.mxu0 %v1815_v15  ;;  %p1645_p8 = pnand %p1644_p0, %p1638_p10 }
  0x92   : > { %1291 = vmatpush3.bf16.msra.mxu1 %v1589_v18 }
  0x93   : > { %1292 = vmatprep.subr.bf16.mxu1 %v1813_v1 }
  0x94   : > { %1430 = vmatpush3.bf16.msra.mxu0 %v1429_v19 }
  0x95   : > { %1431 = vmatprep.subr.bf16.mxu0 %v1815_v15 }
  0x96   : > { %1293 = vmatpush3.bf16.msra.mxu1 %v1590_v22 }
  0x97   : > { %1294 = vmatprep.subr.bf16.mxu1 %v1813_v1 }
  0x98   : > { %1433 = vmatpush3.bf16.msra.mxu0 %v1432_v23 }
  0x99   : > { %1434 = vmatprep.subr.bf16.mxu0 %v1815_v15 }
  0x9a   : > { %1295 = vmatpush3.bf16.msra.mxu1 %v1591_v26 }
  0x9b   : > { %1401 = vmatprep.subr.bf16.mxu1 %v1815_v15 }
  0x9c   : > { %1436 = vmatpush3.bf16.msra.mxu0 %v1435_v29 }
  0x9d   : > { %1297 = vmatmul.mubr.msk.bf16.vlgmr.msra.gmra.mrb[4].mxu1 %vm472_vm1, %v439_v10  ;;  %1437 = vmatprep.subr.bf16.mxu0 %v1815_v15 }
  0x9e   : > { %1403 = vmatpush3.bf16.msra.mxu1 %v1402_v30  ;;  %1344 = vmatprep.mubr.msk.f32.mxu1 %vm1814_vm0, %v1813_v1 }
  0x9f   : > { %1364 = vmatmul.mubr.msk.f32.vlgmr.msra.gmra.mrb[4].mxu0 %vm472_vm1, %v438_v8  ;;  %1404 = vmatprep.subr.bf16.mxu1 %v1815_v15 }
  0xa0   : > { %1439 = vmatpush3.bf16.msra.mxu0 %v1402_v30  ;;  %1398 = vmatprep.mubr.msk.f32.mxu0 %vm1814_vm0, %v1813_v1 }
  0xa1   : > { %1440 = vmatprep.subr.bf16.mxu0 %v1815_v15 }
  0xa2   : > { %1406 = vmatpush3.bf16.msra.mxu1 %v1405_v33 }
  0xa3   : > { %1407 = vmatprep.subr.bf16.mxu1 %v1815_v15 }
  0xa4   : > { %1442 = vmatpush3.bf16.msra.mxu0 %v1405_v33 }
  0xa5   : > { %1443 = vmatprep.subr.bf16.mxu0 %v1815_v15 }
  0xa6   : > { %1409 = vmatpush3.bf16.msra.mxu1 %v1408_v36 }
  0xa7   : > { %1410 = vmatprep.subr.bf16.mxu1 %v1815_v15 }
  0xa8   : > { %1445 = vmatpush3.bf16.msra.mxu0 %v1408_v36 }
  0xa9   : > { %1446 = vmatprep.subr.bf16.mxu0 %v1815_v15 }
  0xaa   : > { %1412 = vmatpush3.bf16.msra.mxu1 %v1411_v39 }
  0xab   : > { %1413 = vmatprep.subr.bf16.mxu1 %v1815_v15 }
  0xac   : > { %1448 = vmatpush3.bf16.msra.mxu0 %v1411_v39 }
  0xad   : > { %1449 = vmatprep.subr.bf16.mxu0 %v1815_v15 }
  0xae   : > { %1415 = vmatpush3.bf16.msra.mxu1 %v1414_v42 }
  0xaf   : > { %1416 = vmatprep.subr.bf16.mxu1 %v1815_v15 }
  0xb0   : > { %1451 = vmatpush3.bf16.msra.mxu0 %v1414_v42 }
  0xb1   : > { %1452 = vmatprep.subr.bf16.mxu0 %v1815_v15 }
  0xb2   : > { %1418 = vmatpush3.bf16.msra.mxu1 %v1417_v45 }
  0xb3   : > { %1419 = vmatprep.subr.bf16.mxu1 %v1815_v15 }
  0xb4   : > { %1454 = vmatpush3.bf16.msra.mxu0 %v1417_v45 }
  0xb5   : > { %1455 = vmatprep.subr.bf16.mxu0 %v1815_v15 }
  0xb6   : > { %1421 = vmatpush3.bf16.msra.mxu1 %v1420_v48 }
  0xb7   : > { %1422 = vmatprep.subr.bf16.mxu1 %v1815_v15 }
  0xb8   : > { %1457 = vmatpush3.bf16.msra.mxu0 %v1420_v48 }
  0xb9   : > { %1458 = vmatprep.subr.bf16.mxu0 %v1815_v15 }
  0xba   : > { %1424 = vmatpush3.bf16.msra.mxu1 %v1423_v51 }
  0xbc   : > { %1460 = vmatpush3.bf16.msra.mxu0 %v1423_v51 }
 0x160   : > { %v510_v52 = vpop.f32.mrb[0].mxu1 }
 0x161   : > { %v1286_v53 = vpop.f32.mrb[1].mxu1  ;;  %v664_v0 = vmul.f32 %v663_v60, %v510_v52 }
 0x162   : > { %v513_v54 = vpop.f32.mrb[2].mxu1  ;;  %v656_v55 = vpop.f32.mrb[0].mxu0 }
 0x163   : > { %v1287_v56 = vpop.f32.mrb[3].mxu1  ;;  %v1310_v57 = vpop.f32.mrb[1].mxu0  ;;  %v671_v5 = vmul.f32 %v670_v62, %v656_v55 }
 0x164   : > { %v659_v58 = vpop.f32.mrb[2].mxu0 }
 0x165   : > { %v1311_v59 = vpop.f32.mrb[3].mxu0 }
 0x170   : > { %v583_v63 = vpop.f32.mrb[4].mxu1 }
 0x171   : > { %v667_v1 = vmul.f32 %v666_v61, %v583_v63  ;;  %v1298_v2 = vpop.f32.mrb[5].mxu1 }
 0x172   : > { %v586_v3 = vpop.f32.mrb[6].mxu1  ;;  %v825_v4 = vpop.f32.mrb[4].mxu0 }
 0x173   : > { %v668_v6 = vadd.f32 %v667_v1, %v664_v0  ;;  %v1299_v7 = vpop.f32.mrb[7].mxu1  ;;  %v1365_v8 = vpop.f32.mrb[5].mxu0  ;;  %1399 = vmatmul.mubr.f32.vlgmr.msra.gmra.mrb[6].mxu0 %v825_v4 }
 0x175   : > { %v672_v9 = vadd.f32 %v671_v5, %v668_v6 }
 0x177   : > { %1345 = vmatmul.mubr.f32.vlgmr.msra.gmra.mrb[8].mxu1 %v672_v9 }
 0x246   : > { %v895_v10 = vpop.f32.mrb[6].mxu0 }
 0x247   : > { %v899_v11 = vmul.f32 0.01, %v895_v10  ;;  %v1400_v12 = vpop.f32.mrb[7].mxu0 }
 0x249   : > { %900 = vst.msk [vmem:[%s412_s16] sm:$0xff] %vm746_vm2, %v899_v11 }
 0x24a   : > { %v742_v14 = vpop.f32.mrb[8].mxu1 }
 0x24b   : > { %v743_v15 = vadd.f32 %v742_v14, %v675_v13  ;;  %v1346_v16 = vpop.f32.mrb[9].mxu1 }
 0x24d   : > { %v901_v17 = vsub.f32 %v743_v15, %v899_v11  ;;  %747 = vst.msk [vmem:[%s2167_s7] sm:$0xff] %vm746_vm2, %v743_v15 }
 0x24f   : > { %v902_v18 = vand.u32 2147483647, %v901_v17 }
 0x251   : > { %v903_v19 = vsel %vm746_vm2, %v902_v18, 0.0 }
 0x252   : > { %904 = vadd.xlane.f32.xlu0 %v903_v19 }
 0x253   : > { %1648 = shalt.err (!%p1645_p8)
}
 0x254   : > { %s1649_s23 = scalar_lea.hbm %s2179_s8, 128  ;;  %s1653_s5 = scalar_lea.hbm %s2340_s0, 512 }
 0x255   : > { %p1650_p9 = scmp.ne.s32.totalorder %s2179_s8, %s1649_s23  ;;  %p1654_p13 = scmp.lt.u32.totalorder %s2179_s8, %s2340_s0 }
 0x256   : > { %p1655_p6 = scmp.lt.u32.totalorder %s1653_s5, %s1649_s23  ;;  %p1657_p2 = scmp.lt.u32.totalorder %s1649_s23, %s2179_s8 }
 0x257   : > { %p1651_p1 = pnand %p1650_p9, %p2343_p5 }
 0x258   : > { %p1656_p3 = por %p1655_p6, %p1654_p13 }
 0x259   : > { %p1652_p4 = pneg %p1651_p1 }
 0x25a   : > { %p1658_p7 = por %p1657_p2, %p1656_p3 }
 0x25c   : > { %p1659_p10 = pnand %p1658_p7, %p1652_p4 }
 0x25e   : > { %1662 = shalt.err (!%p1659_p10)
}
 0x25f   : > { %1482 = dma.vmem_to_hbm [thread:$0]  (%p2343_p5), %s2181_s20, 128, %s2179_s8, %s2188_s27  }
 0x260   : > { %s940_s17 = sshll.u32 %s2167_s7, 4  ;;  %s916_s14 = scalar_lea.sflag [#allocation4], %s2029_s24  ;;  %s941_s17 = int_to_ptr.vmem [resolvable:$true] %s940_s17 }
 0x261   : > { %s1663_s18 = scalar_lea.vmem %s941_s17, 128  ;;  %s1817_s26 = smov [#allocation9]  }
 0x262   : > { %p1664_p12 = scmp.ne.s32.totalorder %s941_s17, %s1663_s18  ;;  %s1667_s9 = sshll.u32 %s1817_s26, 4  ;;  %s1668_s9 = int_to_ptr.vmem [resolvable:$false] %s1667_s9 }
 0x263   : > { %s1669_s11 = scalar_lea.vmem %s1668_s9, 256  ;;  %p1670_p8 = scmp.lt.s32.totalorder %s941_s17, %s1668_s9 }
 0x264   : > { %p1665_p11 = pnand %p1664_p12, %p2343_p5  ;;  %p1671_p9 = scmp.lt.s32.totalorder %s1669_s11, %s1663_s18 }
 0x266   : > { %p1666_p0 = pneg %p1665_p11  ;;  %p1672_p1 = por %p1671_p9, %p1670_p8 }
 0x268   : > { %p1673_p4 = pnand %p1672_p1, %p1666_p0 }
 0x26a   : > { %1676 = shalt.err (!%p1673_p4)
}
 0x26b   : > { %s1677_s7 = scalar_lea.hbm %s2186_s28, 128  ;;  %s1681_s6 = scalar_lea.hbm %s2342_s15, 512 }
 0x26c   : > { %p1678_p13 = scmp.ne.s32.totalorder %s2186_s28, %s1677_s7  ;;  %p1682_p2 = scmp.lt.u32.totalorder %s2186_s28, %s2342_s15 }
 0x26d   : > { %p1683_p7 = scmp.lt.u32.totalorder %s1681_s6, %s1677_s7  ;;  %p1685_p12 = scmp.lt.u32.totalorder %s1677_s7, %s2186_s28 }
 0x26e   : > { %p1679_p6 = pnand %p1678_p13, %p2343_p5 }
 0x26f   : > { %p1684_p10 = por %p1683_p7, %p1682_p2 }
 0x270   : > { %p1680_p3 = pneg %p1679_p6 }
 0x271   : > { %p1686_p11 = por %p1685_p12, %p1684_p10 }
 0x273   : > { %p1687_p0 = pnand %p1686_p11, %p1680_p3 }
 0x275   : > { %1690 = shalt.err (!%p1687_p0)
}
 0x276   : > { %1481 = dma.vmem_to_hbm [thread:$0]  (%p2343_p5), %s941_s17, 128, %s2186_s28, %s916_s14  }
 0x277   : > { %s418_s16 = scalar_lea.vmem [#allocation12], %s2029_s24  ;;  %s1215_s5 = sshll.u32 %s2172_s12, 4 }
 0x278   : > { %s970_s19 = sshll.u32 %s418_s16, 4  ;;  %s2344_s17 = sld [smem:[#allocation32_spill]]  ;;  %s2233_s19 = int_to_ptr.vmem [resolvable:$true] %s970_s19 }
 0x279   : > { %s1691_s18 = scalar_lea.vmem %s2233_s19, 16  ;;  %s1818_s24 = smov [#allocation12]  }
 0x27a   : > { %p1692_p8 = scmp.ne.s32.totalorder %s2233_s19, %s1691_s18  ;;  %s1695_s12 = sshll.u32 %s1818_s24, 4  ;;  %s1696_s12 = int_to_ptr.vmem [resolvable:$false] %s1695_s12 }
 0x27b   : > { %s1697_s26 = scalar_lea.vmem %s1696_s12, 32  ;;  %p1698_p4 = scmp.lt.s32.totalorder %s2233_s19, %s1696_s12 }
 0x27c   : > { %p1693_p9 = pnand %p1692_p8, %p2343_p5  ;;  %p1699_p13 = scmp.lt.s32.totalorder %s1697_s26, %s1691_s18 }
 0x27e   : > { %s2238_s14 = scalar_lea.hbm %s2344_s17, %s1215_s5  ;;  %p1694_p1 = pneg %p1693_p9 }
 0x27f   : > { %p1700_p6 = por %p1699_p13, %p1698_p4 }
 0x281   : > { %p1701_p3 = pnand %p1700_p6, %p1694_p1 }
 0x2df   : > { %v905_v20 = vpop.xlane.xlu0 %904 }
 0x2e0   : > { %v906_v21 = vrot.slane %v905_v20, 4 }
 0x2e2   : > { %v907_v22 = vadd.f32 %v906_v21, %v905_v20 }
 0x2e4   : > { %v908_v23 = vrot.slane %v907_v22, 2 }
 0x2e6   : > { %v909_v24 = vadd.f32 %v908_v23, %v907_v22 }
 0x2e8   : > { %v910_v25 = vrot.slane %v909_v24, 1 }
 0x2ea   : > { %v911_v26 = vadd.f32 %v910_v25, %v909_v24 }
 0x2ec   : > { %1464 = vpush %v911_v26 }
 0x31d   : > { %s1465_s13 = spop %1464 }
 0x31e   : > { %v913_v27 = vstv %s1465_s13 }
 0x31f   : > { %914 = vst [vmem:[%s418_s16] sm:$0x1] %v913_v27 }
 0x320   : > { %1704 = shalt.err (!%p1701_p3)
}
 0x321   : > { %s1705_s9 = scalar_lea.hbm %s2238_s14, 16  ;;  %s1709_s8 = scalar_lea.hbm %s2344_s17, 64 }
 0x322   : > { %p1706_p2 = scmp.ne.s32.totalorder %s2238_s14, %s1705_s9  ;;  %p1710_p12 = scmp.lt.u32.totalorder %s2238_s14, %s2344_s17 }
 0x323   : > { %p1711_p11 = scmp.lt.u32.totalorder %s1709_s8, %s1705_s9  ;;  %p1713_p8 = scmp.lt.u32.totalorder %s1705_s9, %s2238_s14 }
 0x324   : > { %p1707_p7 = pnand %p1706_p2, %p2343_p5 }
 0x325   : > { %p1712_p0 = por %p1711_p11, %p1710_p12 }
 0x326   : > { %p1708_p10 = pneg %p1707_p7 }
 0x327   : > { %p1714_p9 = por %p1713_p8, %p1712_p0 }
 0x329   : > { %p1715_p1 = pnand %p1714_p9, %p1708_p10 }
 0x32b   : > { %1718 = shalt.err (!%p1715_p1)
}
 0x32c   : > { %1483 = dma.vmem_to_hbm [thread:$0]  (%p2343_p5), %s2233_s19, 16, %s2238_s14, %s2188_s27  }
 0x32d PF: > { %s2345_s22 = sld [smem:[#allocation23_spill]]  ;;  %s2346_s23 = sld [smem:[#allocation21_spill]] }
 0x32e   : > { %s2347_s16 = sld [smem:[#allocation27_spill]] }
 0x333   : > { %p1503_p4 = scmp.ge.s32.totalorder %s2345_s22, 2  ;;  %s982_s5 = sand.u32 1, %s2346_s23  }
 0x334   : > { %p2348_p13 = scmp.ne.s32.totalorder %s2347_s16, 0  ;;  %s983_s13 = scalar_lea.sflag [#allocation4], %s982_s5 }
 0x336   : > { %p1492_p6 = pnand %p1503_p4, %p2348_p13 }
 0x338   : > { %1764 = dma.done.wait (!%p1492_p6), %s983_s13, 128  }
 0x339   : > { %1766 = vsyncadd (!%p1492_p6), %s983_s13, 4294967168  ;;  %s2349_s21 = sadd.s32 4294967294, %s2345_s22  }
 0x33a   : > { %s991_s28 = sand.u32 1, %s2349_s21  }
 0x33b   : > { %s992_s18 = scalar_lea.sflag [#allocation11], %s991_s28 }
 0x33c   : > { %1768 = dma.done.wait (!%p1492_p6), %s992_s18, 144  }
 0x33d   : > { %1770 = vsyncadd (!%p1492_p6), %s992_s18, 4294967152  ;;  %s31_s8 = sadd.s32 1, %s2345_s22   ;;  %s2350_s10 = sld [smem:[#allocation22_spill]] }
 0x33e   : > { %p28_p5 = scmp.ge.s32.totalorder %s31_s8, 6   ;;  %s2351_s26 = sld [smem:[#allocation28_spill]] }
 0x33f   : > { %s2352_s19 = sld [smem:[#allocation24_spill]]  ;;  %s2353_s14 = sld [smem:[#allocation25_spill]] }
 0x340   : > { %s2354_s24 = smov %s1777_s25  ;;  %s2356_s27 = smov %s1793_s29 }
 0x341   : > { %s2357_s28 = smov %s1797_s30  ;;  %30 = sbr.rel (!%p28_p5) target bundleno = 17 (0x11), region = 142 }
 0x343   : > { %s2355_s25 = smov %s2350_s10 }
 0x345   : > { %s2358_s29 = smov %s2352_s19  ;;  %s2359_s30 = smov %s2353_s14 }
 0x348   :  { %1005 = vsyncpa [#allocation3], 1 }
 0x349   :  { %1007 = vsyncpa [#allocation3 + $0x1], 1 }
 0x34a   :  { %1008 = vsyncpa [#allocation8], 1 }
 0x34b   :  { %1010 = vsyncpa [#allocation8 + $0x1], 1 }
 0x34c   :  { %1011 = vsyncpa [#allocation4], 1 }
 0x34d   :  { %1013 = vsyncpa [#allocation4 + $0x1], 1 }
 0x34e   :  { %1014 = vsyncpa [#allocation11], 1 }
 0x34f   :  { %1016 = vsyncpa [#allocation11 + $0x1], 1 }
 0x350   :  { %1017 = vsyncpa [#allocation5], 1 }
 0x351   :  { %1019 = vsyncpa [#allocation5 + $0x1], 1 }

</bundles_post_ra>
